<compile_context>
chip_gen: v6e
topology: v6e:2x2x1
jax: 0.10.0
libtpu: 0.0.40
codegen_flags: <defaults>
</compile_context>

<pallas_src>
import jax
import jax.numpy as jnp
from jax import lax
from jax.experimental import pallas as pl
from jax.experimental.pallas import tpu as pltpu

EPS = 1e-6     # SegHead clamp epsilon
BN_EPS = 1e-5  # nn.BatchNorm2d default eps


# --------------------------------------------------------------------------
# Kernel
# --------------------------------------------------------------------------
def _seghead_kernel(scalars_ref, x_ref, wp_ref, scale_ref, bias_ref,
                    o_ref, acc_ref):
    """Grid = (hw_tiles, N, c_chunks); one (tile_c, tile_hw) x chunk per step.

    scalars_ref : SMEM f32[2] = [p, 1/p]
    x_ref       : (tile_c, tile_hw) input chunk
    wp_ref      : (P_pad, tile_c)   sigmoid(w)^p chunk (bf16)
    scale_ref   : (P_pad, 1)        folded BN scale
    bias_ref    : (P_pad, 1)        folded BN bias
    o_ref       : (P_pad, tile_hw)  output tile (resident across c chunks)
    acc_ref     : (P_pad, tile_hw)  f32 accumulator scratch
    """
    k = pl.program_id(2)

    @pl.when(k == 0)
    def _():
        acc_ref[...] = jnp.zeros_like(acc_ref)

    # x^p = exp(p * log(x)) on the EUP, in f32 (accuracy; hides under DMA in
    # the HBM-bound regime).  Only the MXU operand is cast to bf16.
    p = scalars_ref[0]
    x = jnp.maximum(x_ref[...].astype(jnp.float32), EPS)          # (Ct, T)
    xp = jnp.exp(p * jnp.log(x))                                  # x^p

    # Channel-chunk reduction: (P_pad, Ct) @ (Ct, T); bf16 in, f32 accumulate.
    acc_ref[...] += lax.dot_general(
        wp_ref[...], xp.astype(jnp.bfloat16),
        (((1,), (0,)), ((), ())),
        preferred_element_type=jnp.float32)

    @pl.when(k == pl.num_programs(2) - 1)
    def _():
        inv_p = scalars_ref[1]
        s = acc_ref[...]                                          # (P_pad, T)
        y = jnp.exp(jnp.log(s) * inv_p)                           # s^(1/p)
        o_ref[...] = (y * scale_ref[...] + bias_ref[...]).astype(o_ref.dtype)


# --------------------------------------------------------------------------
# Tiling / VMEM planning
# --------------------------------------------------------------------------
def _vmem_capacity_bytes():
    """Physical VMEM per TensorCore, via get_tpu_info with device_kind fallback."""
    try:
        info = pltpu.get_tpu_info()
        cap = int(getattr(info, "vmem_capacity_bytes", 0) or 0)
        if cap > 0:
            return cap
    except Exception:
        pass
    try:
        kind = jax.devices()[0].device_kind.lower()
    except Exception:
        kind = ""
    if "v2" in kind or "v3" in kind:
        return 16 << 20
    if "v7" in kind:
        return 64 << 20
    if "v4" in kind or "v5" in kind or "v6" in kind:
        return 128 << 20
    return 64 << 20  # conservative default


def _vmem_plan():
    """(working budget for the x stream + intermediates, vmem_limit_bytes)."""
    cap = _vmem_capacity_bytes()
    if cap >= (96 << 20):          # v4 / v5e / v6e: 128 MiB physical VMEM
        vmem_limit = 96 << 20
    elif cap >= (48 << 20):        # v7x: 64 MiB physical VMEM
        vmem_limit = 32 << 20
    else:                          # older / unknown small-VMEM chips
        vmem_limit = cap // 2
    work_budget = (vmem_limit * 3) // 5   # headroom for wp/out/compiler scratch
    return work_budget, vmem_limit


def _pick_tile_c(C, target=512):
    """Channel-chunk size: multiple of 128 that divides C, <= target; falls
    back to C (no chunking) when C is small or has no such divisor."""
    if C <= target:
        return C
    best = None
    for d in range(128, target + 1, 128):
        if C % d == 0:
            best = d
    return best if best is not None else C


def _pick_tile_hw(HW, tile_c, x_itemsize, P_pad, out_itemsize, budget):
    """Largest lane tile whose per-step VMEM footprint fits `budget`.

    Per output lane:
      2 * x_itemsize * tile_c   double-buffered x input block
      (4 + 4 + 2)   * tile_c    f32 x, f32 xp, bf16 MXU operand live in-body
      (4 + 2*out)   * P_pad     f32 accumulator + double-buffered output block
    """
    per_lane = tile_c * (2 * x_itemsize + 10) + P_pad * (4 + 2 * out_itemsize)
    lanes = max(1, budget // per_lane)
    cap = max(128, min(16384, (lanes // 128) * 128))
    if HW <= cap:
        return HW          # full-extent last dim is always a legal block shape
    return cap             # multiple of 128; pl.cdiv grid covers the remainder


# --------------------------------------------------------------------------
# Wrapper
# --------------------------------------------------------------------------
def seghead_forward(x_nchw, fc_w, p, bn_gamma, bn_beta, bn_mean, bn_var, *,
                    tile_hw=None, tile_c=None, out_dtype=None,
                    return_padded_parts=False):
    """x_nchw: (N, C, H, W); fc_w: (P, C); p: (1,); bn_*: (P,).

    Returns (N, P, H, W) (or (N, P_pad, H, W) if return_padded_parts, which
    avoids one extra HBM pass for the part-slice)."""
    N, C, H, W = x_nchw.shape
    P = fc_w.shape[0]
    HW = H * W
    if out_dtype is None:
        out_dtype = x_nchw.dtype

    # Pad num_parts to a full sublane group (8) -> unmasked lane-dense stores.
    P_pad = max(8, ((P + 7) // 8) * 8)

    work_budget, vmem_limit = _vmem_plan()
    if tile_c is None:
        tile_c = _pick_tile_c(C)
    assert tile_c == C or (tile_c % 128 == 0 and C % tile_c == 0), (C, tile_c)
    num_c_tiles = C // tile_c
    if tile_hw is None:
        tile_hw = _pick_tile_hw(HW, tile_c, x_nchw.dtype.itemsize, P_pad,
                                jnp.dtype(out_dtype).itemsize, work_budget)
    num_hw_tiles = pl.cdiv(HW, tile_hw)

    # NCHW -> (N, C, HW): free reshape (no transpose, no extra HBM pass).
    x = x_nchw.reshape(N, C, HW)

    # Hoisted grid-invariant math: [p, 1/p], sigmoid(w)^p, folded BN affine.
    p_f32 = p.astype(jnp.float32).reshape(1)
    pv = p_f32[0]
    scalars = jnp.concatenate([p_f32, 1.0 / p_f32])                # [p, 1/p]
    wp = jax.nn.sigmoid(fc_w.astype(jnp.float32)) ** pv            # (P, C)
    scale = bn_gamma.astype(jnp.float32) * lax.rsqrt(
        bn_var.astype(jnp.float32) + BN_EPS)                       # (P,)
    bias = bn_beta.astype(jnp.float32) - bn_mean.astype(jnp.float32) * scale
    # (BN scale is intentionally NOT folded into wp: gamma < 0 => scale^p NaN.)

    wp = jnp.pad(wp, ((0, P_pad - P), (0, 0)), constant_values=1.0)
    scale = jnp.pad(scale, (0, P_pad - P), constant_values=1.0)
    bias = jnp.pad(bias, (0, P_pad - P))

    out = pl.pallas_call(
        _seghead_kernel,
        out_shape=jax.ShapeDtypeStruct((N, P_pad, HW), out_dtype),
        # HW tiles lead so megacore sharding balances even when N == 1;
        # the C reduction axis is last ("arbitrary").
        grid=(num_hw_tiles, N, num_c_tiles),
        in_specs=[
            pl.BlockSpec(memory_space=pltpu.MemorySpace.SMEM),       # [p, 1/p]
            pl.BlockSpec((pl.Squeezed(), tile_c, tile_hw),
                         lambda j, n, k: (n, k, j)),                 # x chunk
            pl.BlockSpec((P_pad, tile_c), lambda j, n, k: (0, k)),   # sigmoid(w)^p
            pl.BlockSpec((P_pad, 1), lambda j, n, k: (0, 0)),        # BN scale
            pl.BlockSpec((P_pad, 1), lambda j, n, k: (0, 0)),        # BN bias
        ],
        out_specs=pl.BlockSpec((pl.Squeezed(), P_pad, tile_hw),
                               lambda j, n, k: (n, 0, j)),
        scratch_shapes=[pltpu.VMEM((P_pad, tile_hw), jnp.float32)],
        compiler_params=pltpu.CompilerParams(
            dimension_semantics=("parallel", "parallel", "arbitrary"),
            vmem_limit_bytes=int(vmem_limit)),
    )(scalars, x, wp.astype(jnp.bfloat16),
      scale.reshape(P_pad, 1), bias.reshape(P_pad, 1))

    out = out.reshape(N, P_pad, H, W)
    if return_padded_parts:
        return out
    # NOTE: this slice is one extra HBM read+write over the padded output
    # (P_pad/P overhead); callers that can consume the padded layout should
    # pass return_padded_parts=True.
    return out[:, :P]


# --------------------------------------------------------------------------
# Pure-JAX reference (mirrors the PyTorch forward, eval-mode BN)
# --------------------------------------------------------------------------
def seghead_reference(x_nchw, fc_w, p, bn_gamma, bn_beta, bn_mean, bn_var):
    pv = p[0]
    xc = jnp.maximum(x_nchw, EPS)                                   # (N,C,H,W)
    ws = jax.nn.sigmoid(fc_w)                                       # (P,C)
    t = (xc[:, None, :, :, :] * ws[None, :, :, None, None]) ** pv   # (N,P,C,H,W)
    y = jnp.sum(t, axis=2) ** (1.0 / pv)                            # (N,P,H,W)
    scale = bn_gamma / jnp.sqrt(bn_var + BN_EPS)
    bias = bn_beta - bn_mean * scale
    return y * scale[None, :, None, None] + bias[None, :, None, None]


if __name__ == "__main__":
    def run_case(N, in_c, H, W, num_parts, key, **kw):
        kx, kwt = jax.random.split(key)
        # Positive-ish activations, like post-ReLU backbone features.
        x = jax.random.uniform(kx, (N, in_c, H, W), jnp.float32, 0.0, 2.0)
        # kaiming_normal_(mode='fan_out'), fan_out = 1 => std = sqrt(2).
        fc_w = jax.random.normal(kwt, (num_parts, in_c), jnp.float32) * jnp.sqrt(2.0)
        p = jnp.ones((1,), jnp.float32) * 3.0
        g = jnp.ones((num_parts,), jnp.float32)
        b = jnp.zeros((num_parts,), jnp.float32)
        m = jnp.zeros((num_parts,), jnp.float32)
        v = jnp.ones((num_parts,), jnp.float32)

        out = jax.block_until_ready(
            seghead_forward(x, fc_w, p, g, b, m, v, **kw))
        ref = seghead_reference(x, fc_w, p, g, b, m, v)
        assert out.shape == (N, num_parts, H, W), out.shape
        err = float(jnp.max(jnp.abs(out - ref)))
        # bf16 MXU operands bound the accuracy; 2e-2 still catches layout bugs.
        assert jnp.allclose(out, ref, rtol=2e-2, atol=2e-2), err

    key = jax.random.PRNGKey(0)
    k1, k2 = jax.random.split(key)

    # Case 1: default path (no C chunking, single HW tile).
    run_case(2, 32, 16, 16, 3, k1)
    # Case 2: exercise the C-chunk accumulator (pl.when init/finalize) and a
    # partial last HW tile (masked store) with small forced tiles.
    run_case(1, 256, 16, 12, 3, k2, tile_c=128, tile_hw=128)

    print("KERNEL_OK")
</pallas_src>

<mosaic_0001>
module attributes {stable_mosaic.version = 11 : i64} {
  func.func @_seghead_kernel(%arg0: i32, %arg1: i32, %arg2: i32, %arg3: memref<2xf32, #tpu.memory_space<smem>>, %arg4: memref<1x32x256xf32, #tpu.memory_space<vmem>>, %arg5: memref<8x32xbf16, #tpu.memory_space<vmem>>, %arg6: memref<8x1xf32, #tpu.memory_space<vmem>>, %arg7: memref<8x1xf32, #tpu.memory_space<vmem>>, %arg8: memref<1x8x256xf32, #tpu.memory_space<vmem>>, %arg9: memref<8x256xf32, #tpu.memory_space<vmem>>) attributes {dimension_semantics = [#tpu.dimension_semantics<parallel>, #tpu.dimension_semantics<parallel>, #tpu.dimension_semantics<arbitrary>], iteration_bounds = array<i64: 1, 2, 1>, scalar_prefetch = 0 : i64, scratch_operands = 1 : i64, tpu.core_type = #tpu.core_type<tc>, window_params = [{transform_indices = @transform_0, window_bounds = array<i64: 2>}, {transform_indices = @transform_1, window_bounds = array<i64: 1, 32, 256>}, {transform_indices = @transform_2, window_bounds = array<i64: 8, 32>}, {pipeline_mode = #tpu.pipeline_mode<synchronous>, transform_indices = @transform_3, window_bounds = array<i64: 8, 1>}, {pipeline_mode = #tpu.pipeline_mode<synchronous>, transform_indices = @transform_4, window_bounds = array<i64: 8, 1>}, {transform_indices = @transform_5, window_bounds = array<i64: 1, 8, 256>}]} {
    %c0_i32 = arith.constant 0 : i32
    %0 = arith.cmpi eq, %arg2, %c0_i32 : i32
    %1 = arith.extui %0 : i1 to i32
    %c0_i32_0 = arith.constant 0 : i32
    %2 = arith.cmpi ne, %1, %c0_i32_0 : i32
    scf.if %2 {
      %cst_13 = arith.constant 0.000000e+00 : f32
      %21 = vector.broadcast %cst_13 : f32 to vector<8x256xf32>
      %c0_14 = arith.constant 0 : index
      %c0_15 = arith.constant 0 : index
      %22 = vector.load %arg9[%c0_14, %c0_15] : memref<8x256xf32, #tpu.memory_space<vmem>>, vector<8x256xf32>
      tpu.vector_store %arg9[%c0_14, %c0_15], %21 {strides = array<i32>} : memref<8x256xf32, #tpu.memory_space<vmem>>, vector<8x256xf32>,
    } else {
    }
    %c0 = arith.constant 0 : index
    %3 = memref.load %arg3[%c0] : memref<2xf32, #tpu.memory_space<smem>>
    %c0_1 = arith.constant 0 : index
    %c0_2 = arith.constant 0 : index
    %c0_3 = arith.constant 0 : index
    %4 = vector.load %arg4[%c0_1, %c0_2, %c0_3] : memref<1x32x256xf32, #tpu.memory_space<vmem>>, vector<1x32x256xf32>
    %5 = vector.shape_cast %4 : vector<1x32x256xf32> to vector<32x256xf32>
    %cst = arith.constant 9.99999997E-7 : f32
    %6 = vector.broadcast %cst : f32 to vector<32x256xf32>
    %7 = arith.maximumf %5, %6 : vector<32x256xf32>
    %8 = math.log %7 : vector<32x256xf32>
    %9 = vector.broadcast %3 : f32 to vector<32x256xf32>
    %10 = arith.mulf %9, %8 : vector<32x256xf32>
    %11 = math.exp %10 : vector<32x256xf32>
    %c0_4 = arith.constant 0 : index
    %c0_5 = arith.constant 0 : index
    %12 = vector.load %arg9[%c0_4, %c0_5] : memref<8x256xf32, #tpu.memory_space<vmem>>, vector<8x256xf32>
    %c0_6 = arith.constant 0 : index
    %c0_7 = arith.constant 0 : index
    %13 = vector.load %arg5[%c0_6, %c0_7] : memref<8x32xbf16, #tpu.memory_space<vmem>>, vector<8x32xbf16>
    %14 = arith.truncf %11 : vector<32x256xf32> to vector<32x256xbf16>
    %cst_8 = arith.constant dense<0.000000e+00> : vector<8x256xf32>
    %15 = tpu.matmul %13, %14, %cst_8 {dimension_numbers = #tpu.dot_dimension_numbers<[1], [0], [0], [1], [0, 0, 1, 1], [], []>} : vector<8x32xbf16>, vector<32x256xbf16>, vector<8x256xf32> -> vector<8x256xf32>
    %16 = arith.addf %12, %15 : vector<8x256xf32>
    %c0_9 = arith.constant 0 : index
    %c0_10 = arith.constant 0 : index
    %17 = vector.load %arg9[%c0_9, %c0_10] : memref<8x256xf32, #tpu.memory_space<vmem>>, vector<8x256xf32>
    tpu.vector_store %arg9[%c0_9, %c0_10], %16 {strides = array<i32>} : memref<8x256xf32, #tpu.memory_space<vmem>>, vector<8x256xf32>,
    %c0_i32_11 = arith.constant 0 : i32
    %18 = arith.cmpi eq, %arg2, %c0_i32_11 : i32
    %19 = arith.extui %18 : i1 to i32
    %c0_i32_12 = arith.constant 0 : i32
    %20 = arith.cmpi ne, %19, %c0_i32_12 : i32
    scf.if %20 {
      %c1 = arith.constant 1 : index
      %21 = memref.load %arg3[%c1] : memref<2xf32, #tpu.memory_space<smem>>
      %c0_13 = arith.constant 0 : index
      %c0_14 = arith.constant 0 : index
      %22 = vector.load %arg9[%c0_13, %c0_14] : memref<8x256xf32, #tpu.memory_space<vmem>>, vector<8x256xf32>
      %23 = math.log %22 : vector<8x256xf32>
      %24 = vector.broadcast %21 : f32 to vector<8x256xf32>
      %25 = arith.mulf %23, %24 : vector<8x256xf32>
      %26 = math.exp %25 : vector<8x256xf32>
      %c0_15 = arith.constant 0 : index
      %c0_16 = arith.constant 0 : index
      %27 = vector.load %arg6[%c0_15, %c0_16] : memref<8x1xf32, #tpu.memory_space<vmem>>, vector<8x1xf32>
      %28 = vector.broadcast %27 : vector<8x1xf32> to vector<8x256xf32>
      %29 = arith.mulf %26, %28 : vector<8x256xf32>
      %c0_17 = arith.constant 0 : index
      %c0_18 = arith.constant 0 : index
      %30 = vector.load %arg7[%c0_17, %c0_18] : memref<8x1xf32, #tpu.memory_space<vmem>>, vector<8x1xf32>
      %31 = vector.broadcast %30 : vector<8x1xf32> to vector<8x256xf32>
      %32 = arith.addf %29, %31 : vector<8x256xf32>
      %c0_19 = arith.constant 0 : index
      %c0_20 = arith.constant 0 : index
      %c0_21 = arith.constant 0 : index
      %33 = vector.load %arg8[%c0_19, %c0_20, %c0_21] : memref<1x8x256xf32, #tpu.memory_space<vmem>>, vector<1x8x256xf32>
      %34 = vector.shape_cast %33 : vector<1x8x256xf32> to vector<8x256xf32>
      %35 = vector.shape_cast %32 : vector<8x256xf32> to vector<1x8x256xf32>
      tpu.vector_store %arg8[%c0_19, %c0_20, %c0_21], %35 {strides = array<i32>} : memref<1x8x256xf32, #tpu.memory_space<vmem>>, vector<1x8x256xf32>,
    } else {
    }
    return
  }
  func.func @transform_0(%arg0: i32, %arg1: i32, %arg2: i32) -> i32 {
    %c0_i32 = arith.constant 0 : i32
    %c0_i32_0 = arith.constant 0 : i32
    return %c0_i32 : i32
  }
  func.func @transform_1(%arg0: i32, %arg1: i32, %arg2: i32) -> (i32, i32, i32) {
    %c0_i32 = arith.constant 0 : i32
    return %arg1, %arg2, %arg0 : i32, i32, i32
  }
  func.func @transform_2(%arg0: i32, %arg1: i32, %arg2: i32) -> (i32, i32) {
    %c0_i32 = arith.constant 0 : i32
    %c0_i32_0 = arith.constant 0 : i32
    return %c0_i32, %arg2 : i32, i32
  }
  func.func @transform_3(%arg0: i32, %arg1: i32, %arg2: i32) -> (i32, i32) {
    %c0_i32 = arith.constant 0 : i32
    %c0_i32_0 = arith.constant 0 : i32
    %c0_i32_1 = arith.constant 0 : i32
    return %c0_i32, %c0_i32_0 : i32, i32
  }
  func.func @transform_4(%arg0: i32, %arg1: i32, %arg2: i32) -> (i32, i32) {
    %c0_i32 = arith.constant 0 : i32
    %c0_i32_0 = arith.constant 0 : i32
    %c0_i32_1 = arith.constant 0 : i32
    return %c0_i32, %c0_i32_0 : i32, i32
  }
  func.func @transform_5(%arg0: i32, %arg1: i32, %arg2: i32) -> (i32, i32, i32) {
    %c0_i32 = arith.constant 0 : i32
    %c0_i32_0 = arith.constant 0 : i32
    return %arg1, %c0_i32, %arg0 : i32, i32, i32
  }
}

</mosaic_0001>

<bundles_post_ra>
// kernel: tpu_custom_call.1
= control target key start
LH: loop header
LB: loop body
LE: loop exit
PB: predicated region body
PF: predicated region fallthrough
CT: control target
= control target key end

     0   :  { %s1079_s0 = inlined_call_operand.vmem [shape: f32[2], index: 0, kind: input, shape index: {}]   ;;  %s1080_s1 = inlined_call_operand.hbm [shape: f32[2,32,256], index: 1, kind: input, shape index: {}]   ;;  %s1081_s2 = inlined_call_operand.vmem [shape: bf16[8,32], index: 2, kind: input, shape index: {}]   ;;  %s1082_s3 = inlined_call_operand.vmem [shape: f32[8,1], index: 3, kind: input, shape index: {}]   ;;  %s1083_s4 = inlined_call_operand.vmem [shape: f32[8,1], index: 4, kind: input, shape index: {}]   ;;  %s1084_s5 = inlined_call_operand.hbm [shape: f32[2,8,256], index: 5, kind: output, shape index: {}]  }
   0x1   :  { %1089 = sst [smem:[#allocation14_spill]] %s1079_s0 }
   0x2   :  { %10 = vsyncpa [#allocation6], 0 }
   0x3   :  { %11 = vsyncpa [#allocation4], 0 }
   0x4   :  { %13 = vsyncpa [#allocation4 + $0x1], 0 }
   0x5   :  { %14 = vsyncpa [#allocation5], 0 }
   0x6   :  { %16 = vsyncpa [#allocation5 + $0x1], 0  ;;  %s900_s18 = smov 0   ;;  %s902_s19 = smov 0  }
   0x7   :  { %s904_s20 = smov 0   ;;  %s906_s21 = smov 0  }
   0x8   :  { %s908_s22 = smov 0   ;;  %s910_s23 = smov 0  }
   0x9 LB: > { %1090 = sst [smem:[#allocation12_spill]] %s862_s23  ;;  %s596_s24 = sadd.s32 4294967295, %s862_s23   ;;  %s862_s23 = sphi %s910_s23, %s1113_s23   ;;  %s858_s22 = sphi %s908_s22, %s1112_s22   ;;  %s854_s21 = sphi %s906_s21, %s1111_s21   ;;  %s850_s20 = sphi %s904_s20, %s1110_s20   ;;  %s846_s19 = sphi %s902_s19, %s1109_s19   ;;  %s842_s18 = sphi %s900_s18, %s1108_s18  }
   0xa   : > { %s597_s25 = sadd.s32 4294967294, %s862_s23   ;;  %p80_p0 = scmp.ne.s32.totalorder %s850_s20, %s846_s19 }
   0xb   : > { %p81_p1 = scmp.eq.s32.totalorder %s862_s23, 0  ;;  %p86_p2 = scmp.ne.s32.totalorder %s846_s19, %s842_s18 }
   0xc   : > { %p938_p3 = scmp.eq.s32.totalorder %s596_s24, 0  ;;  %p180_p4 = scmp.eq.s32.totalorder %s596_s24, 1 }
   0xd   : > { %p942_p5 = por %p81_p1, %p80_p0  ;;  %p186_p6 = scmp.eq.s32.totalorder %s597_s25, 1 }
   0xe   : > { %p948_p7 = por %p938_p3, %p86_p2  ;;  %p952_p8 = por %p180_p4, %p80_p0 }
   0xf   : > { %p956_p9 = por %p186_p6, %p86_p2  ;;  %p598_p10 = scmp.ge.s32.totalorder %s862_s23, 1 }
  0x10   : > { %s1094_s30 = scalar_select %p952_p8, 1, 0 }
  0x11   : > { %s1095_s6 = scalar_select %p956_p9, 1, 0 }
  0x12   : > { %p193_p11 = scmp.lt.s32.totalorder %s862_s23, 3  ;;  %s1097_s0 = sld [smem:[#allocation14_spill]] }
  0x13   : > { %1096 = sst [smem:[#allocation13_spill]] %s1095_s6  ;;  %p639_p0 = scmp.lt.s32.totalorder %s862_s23, 2 }
  0x14   : > { %p965_p12 = pnand %p598_p10, %p193_p11  ;;  %s37_s13 = sadd.s32 1, %s858_s22 }
  0x15   : > { %p975_p2 = pnand %p639_p0, %p942_p5  ;;  %p986_p6 = scmp.ge.s32.totalorder %s37_s13, 2 }
  0x16   : > { %p626_p1 = pneg %p965_p12  ;;  %s230_s15 = sand.u32 1, %s850_s20  }
  0x18   : > { %s206_s9 = sshll.u32 %s1097_s0, 4  ;;  %p981_p4 = pnand %p626_p1, %p938_p3  ;;  %s207_s9 = int_to_ptr.vmem [resolvable:$true] %s206_s9 }
  0x19   : > { %s735_s16 = scalar_lea.vmem %s207_s9, 16  ;;  %p743_p13 = scmp.lt.s32.totalorder %s207_s9, %s207_s9 }
  0x1a   : > { %p736_p10 = scmp.ne.s32.totalorder %s207_s9, %s735_s16  ;;  %p737_p11 = pneg %p981_p4 }
  0x1b   : > { %p744_p9 = scmp.lt.s32.totalorder %s735_s16, %s735_s16 }
  0x1c   : > { %p738_p5 = pnand %p737_p11, %p736_p10 }
  0x1d   : > { %p745_p8 = por %p744_p9, %p743_p13 }
  0x1e   : > { %p739_p0 = pneg %p738_p5 }
  0x20   : > { %p746_p1 = pnand %p745_p8, %p739_p0 }
  0x22   : > { %749 = shalt.err (!%p746_p1)
}
  0x23   : > { %s864_s17 = smov [#allocation3]   ;;  %s1115_s13 = smov (%p986_p6, %s37_s13), 0 }
  0x24   : > { %629 = dma.vmem_to_smem (!%p981_p4), %s207_s9, 16, %s864_s17, [#allocation6]  }
  0x25   : > { %s602_s24 = sshll.u32 %s230_s15, 6  ;;  %s66_s25 = ssub.s32 %s858_s22, %s1115_s13 }
  0x26   : > { %p71_p10 = scmp.eq.s32.totalorder %s66_s25, 0  ;;  %s616_s28 = sshll.u32 %s858_s22, 10 }
  0x27   : > { %s245_s16 = scalar_lea.hbm %s1080_s1, %s616_s28  ;;  %s234_s12 = scalar_lea.vmem [#allocation7], %s602_s24 }
  0x28   : > { %s246_s26 = sshll.u32 %s234_s12, 4  ;;  %s1102_s0 = sadd.s32 1, %s850_s20  ;;  %s247_s26 = int_to_ptr.vmem [resolvable:$true] %s246_s26 }
  0x29   : > { %s1008_s23 = scalar_select %p71_p10, %s850_s20, %s1102_s0  }
  0x2a   : > { %s231_s6 = scalar_lea.sflag [#allocation4], %s230_s15  ;;  %p752_p8 = pneg %p975_p2 }
  0x2b   : > { %s763_s9 = scalar_lea.vmem %s247_s26, 1024  ;;  %s865_s14 = smov [#allocation7]  }
  0x2c   : > { %p764_p9 = scmp.ne.s32.totalorder %s247_s26, %s763_s9  ;;  %s768_s17 = sshll.u32 %s865_s14, 4  ;;  %s769_s17 = int_to_ptr.vmem [resolvable:$false] %s768_s17 }
  0x2d   : > { %s770_s25 = scalar_lea.vmem %s769_s17, 2048  ;;  %p771_p6 = scmp.lt.s32.totalorder %s247_s26, %s769_s17 }
  0x2e   : > { %p766_p13 = pnand %p764_p9, %p752_p8  ;;  %p772_p11 = scmp.lt.s32.totalorder %s770_s25, %s763_s9 }
  0x30   : > { %p767_p4 = pneg %p766_p13  ;;  %p773_p5 = por %p772_p11, %p771_p6 }
  0x32   : > { %p774_p0 = pnand %p773_p5, %p767_p4 }
  0x34   : > { %777 = shalt.err (!%p774_p0)
}
  0x35   : > { %s866_s24 = smov 256   ;;  %s867_s0 = smov 16  }
  0x36   : > { %633 = dma.hbm_to_vmem [thread:$0]  (!%p975_p2), %s245_s16, 1024, %s247_s26, %s231_s6, %s866_s24, %s866_s24, %s867_s0  }
  0x37   : > { %258 = sbr.rel (%p965_p12) target bundleno = 362 (0x16a), region = 40 }
  0x3c   : > { %829 = dma.done.wait (%p938_p3), [#allocation6], 16  }
  0x3d   : > { %831 = vsyncadd (%p938_p3), [#allocation6], 4294967280  ;;  %s1021_s15 = sand.u32 1, %s846_s19  }
  0x3e   : > { %s607_s28 = sshll.u32 %s1021_s15, 6  ;;  %s265_s7 = scalar_lea.sflag [#allocation4], %s1021_s15 }
  0x3f   : > { %s268_s8 = scalar_lea.vmem [#allocation7], %s607_s28 }
  0x40   : > { %833 = dma.done.wait (%p948_p7), %s265_s7, 1024  }
  0x41   : > { %835 = vsyncadd (%p948_p7), %s265_s7, 4294966272 }
  0x42   : > { %273 = sfence }
  0x43   : > { %v320_v0 = vld [vmem:[%s268_s8 + $0x28] sm:$0xff]  ;;  %v322_v1 = vld [vmem:[%s268_s8 + $0x38] sm:$0xff]  ;;  %v319_v2 = vld [vmem:[%s268_s8 + $0x20] sm:$0xff]  ;;  %v868_v7 = vmov 0   ;;  %s314_s10 = sld [smem:[#allocation3]]  ;;  %vm379_vm0 = vcmask 261120  }
  0x44   : > { %v328_v3 = vmax.f32 %v320_v0, 1e-06  ;;  %v330_v4 = vmax.f32 %v322_v1, 1e-06  ;;  %v321_v5 = vld [vmem:[%s268_s8 + $0x30] sm:$0xff]  ;;  %v316_v6 = vld [vmem:[%s268_s8 + $0x8] sm:$0xff]  ;;  %415 = vmatprep.mubr.bf16.mxu0 %v868_v7  ;;  %694 = vset.pattern.permute.xlu0 %v868_v7 }
  0x45   : > { %v327_v8 = vmax.f32 %v319_v2, 1e-06  ;;  %v329_v9 = vmax.f32 %v321_v5, 1e-06  ;;  %v318_v10 = vld [vmem:[%s268_s8 + $0x18] sm:$0xff]  ;;  %v315_v11 = vld [vmem:[%s268_s8] sm:$0xff] }
  0x46   : > { %695 = vlog2.f32 %v328_v3  ;;  %v324_v12 = vmax.f32 %v316_v6, 1e-06  ;;  %v317_v13 = vld [vmem:[%s268_s8 + $0x10] sm:$0xff]  ;;  %v326_v14 = vmax.f32 %v318_v10, 1e-06  ;;  %v445_v16 = vld [vmem:[%s1082_s3] sm:$0xff] }
  0x47   : > { %697 = vlog2.f32 %v330_v4  ;;  %v323_v15 = vmax.f32 %v315_v11, 1e-06  ;;  %v325_v17 = vmax.f32 %v317_v13, 1e-06  ;;  %448 = vperm.xlu0 %694, %v445_v16   ;;  %v453_v18 = vld [vmem:[%s1083_s4] sm:$0xff]  ;;  %s610_s12 = sld [smem:[#allocation3 + $0x1]] }
  0x48   : > { %699 = vlog2.f32 %v327_v8  ;;  %v374_v0 = vld [vmem:[%s1081_s2] sm:$0xf]  ;;  %s608_s9 = sshll.u32 %s1021_s15, 4  ;;  %s617_s14 = sshll.u32 %s854_s21, 8 }
  0x49   : > { %701 = vlog2.f32 %v329_v9  ;;  %v347_v20 = vstv %s314_s10  ;;  %s299_s17 = scalar_lea.vmem [#allocation8], %s608_s9  ;;  %s478_s28 = scalar_lea.hbm %s1084_s5, %s617_s14 }
  0x4a   : > { %703 = vlog2.f32 %v324_v12  ;;  %s480_s25 = sshll.u32 %s299_s17, 4  ;;  %s464_s7 = scalar_lea.sflag [#allocation5], %s1021_s15  ;;  %s481_s25 = int_to_ptr.vmem [resolvable:$true] %s480_s25 }
  0x4b   : > { %705 = vlog2.f32 %v326_v14  ;;  %456 = vperm.xlu0 %694, %v453_v18   ;;  %s778_s8 = scalar_lea.vmem %s481_s25, 256  ;;  %p1103_p7 = scmp.ne.s32.totalorder %s1094_s30, 0 }
  0x4c   : > { %707 = vlog2.f32 %v323_v15  ;;  %p779_p3 = scmp.ne.s32.totalorder %s481_s25, %s778_s8  ;;  %s869_s26 = smov [#allocation8]  }
  0x4d   : > { %709 = vlog2.f32 %v325_v17  ;;  %v438_v6 = vstv %s610_s12  ;;  %s782_s21 = sshll.u32 %s869_s26, 4  ;;  %s783_s21 = int_to_ptr.vmem [resolvable:$false] %s782_s21 }
  0x4e   : > { %p780_p12 = pnand %p779_p3, %p1103_p7  ;;  %s784_s27 = scalar_lea.vmem %s783_s21, 512 }
  0x4f   : > { %p785_p1 = scmp.lt.s32.totalorder %s481_s25, %s783_s21  ;;  %p786_p10 = scmp.lt.s32.totalorder %s784_s27, %s778_s8 }
  0x50   : > { %p781_p2 = pneg %p780_p12 }
  0x51   : > { %p787_p8 = por %p786_p10, %p785_p1 }
  0x53   : > { %v696_v19 = vpop.eup %695  ;;  %p788_p9 = pnand %p787_p8, %p781_p2 }
  0x54   : > { %v698_v21 = vpop.eup %697  ;;  %v342_v22 = vmul.f32 0.6931472, %v696_v19 }
  0x55   : > { %v700_v23 = vpop.eup %699  ;;  %v346_v24 = vmul.f32 0.6931472, %v698_v21 }
  0x56   : > { %v702_v25 = vpop.eup %701  ;;  %v353_v26 = vmul.f32 %v347_v20, %v342_v22  ;;  %v340_v27 = vmul.f32 0.6931472, %v700_v23 }
  0x57   : > { %v704_v28 = vpop.eup %703  ;;  %v355_v29 = vmul.f32 %v347_v20, %v346_v24  ;;  %v344_v30 = vmul.f32 0.6931472, %v702_v25 }
  0x58   : > { %v706_v31 = vpop.eup %705  ;;  %v366_v32 = vmul.f32 1.442695, %v353_v26  ;;  %v352_v33 = vmul.f32 %v347_v20, %v340_v27  ;;  %v334_v34 = vmul.f32 0.6931472, %v704_v28 }
  0x59   : > { %v708_v35 = vpop.eup %707  ;;  %v370_v36 = vmul.f32 1.442695, %v355_v29  ;;  %v354_v37 = vmul.f32 %v347_v20, %v344_v30  ;;  %v338_v38 = vmul.f32 0.6931472, %v706_v31 }
  0x5a   : > { %v710_v39 = vpop.eup %709  ;;  %711 = vpow2.f32 %v366_v32  ;;  %v364_v40 = vmul.f32 1.442695, %v352_v33  ;;  %v349_v41 = vmul.f32 %v347_v20, %v334_v34  ;;  %v332_v42 = vmul.f32 0.6931472, %v708_v35 }
  0x5b   : > { %713 = vpow2.f32 %v370_v36  ;;  %v368_v43 = vmul.f32 1.442695, %v354_v37  ;;  %v351_v44 = vmul.f32 %v347_v20, %v338_v38  ;;  %v336_v45 = vmul.f32 0.6931472, %v710_v39 }
  0x5c   : > { %715 = vpow2.f32 %v364_v40  ;;  %v358_v46 = vmul.f32 1.442695, %v349_v41  ;;  %v348_v47 = vmul.f32 %v347_v20, %v332_v42 }
  0x5d   : > { %717 = vpow2.f32 %v368_v43  ;;  %v362_v48 = vmul.f32 1.442695, %v351_v44  ;;  %v350_v49 = vmul.f32 %v347_v20, %v336_v45 }
  0x5e   : > { %719 = vpow2.f32 %v358_v46  ;;  %v356_v50 = vmul.f32 1.442695, %v348_v47 }
  0x5f   : > { %721 = vpow2.f32 %v362_v48  ;;  %v360_v51 = vmul.f32 1.442695, %v350_v49 }
  0x60   : > { %723 = vpow2.f32 %v356_v50 }
  0x61   : > { %725 = vpow2.f32 %v360_v51 }
  0x67   : > { %v712_v52 = vpop.eup %711 }
  0x68   : > { %v714_v53 = vpop.eup %713 }
  0x69   : > { %v716_v54 = vpop.eup %715  ;;  %v378_v55 = vpack.c.bf16 %v714_v53, %v712_v52 }
  0x6a   : > { %v718_v56 = vpop.eup %717 }
  0x6b   : > { %v720_v57 = vpop.eup %719  ;;  %395 = vmatprep.subr.bf16.mxu0 %v378_v55  ;;  %v377_v58 = vpack.c.bf16 %v718_v56, %v716_v54 }
  0x6c   : > { %v722_v59 = vpop.eup %721 }
  0x6d   : > { %v724_v60 = vpop.eup %723  ;;  %396 = vmatpush1.bf16.msra.mxu0 %v377_v58  ;;  %v376_v61 = vpack.c.bf16 %v722_v59, %v720_v57 }
  0x6e   : > { %v726_v62 = vpop.eup %725 }
  0x6f   : > { %397 = vmatprep.subr.bf16.mxu0 %v376_v61  ;;  %v375_v63 = vpack.c.bf16 %v726_v62, %v724_v60 }
  0x71   : > { %398 = vmatpush1.bf16.msra.mxu0 %v375_v63 }
  0x74   : > { %609 = vmatmul.mubr.msk.bf16.vlgmr.msra.gmra.mxu0 %vm379_vm0, %v374_v0 }
  0xc2   : > { %v449_v14 = vpop.permute.xlu0 %448 }
  0xc6   : > { %v457_v18 = vpop.permute.xlu0 %456 }
 0x134   : > { %v417_v1 = vpop.f32.mrf.mxu0 }
 0x135   : > { %727 = vlog2.f32 %v417_v1 }
 0x136   : > { %v419_v2 = vpop.f32.mrf.mxu0 }
 0x137   : > { %729 = vlog2.f32 %v419_v2 }
 0x138   : > { %v421_v3 = vpop.f32.mrf.mxu0 }
 0x13a   : > { %v422_v4 = vpop.f32.mrf.mxu0 }
 0x142   : > { %v728_v5 = vpop.eup %727 }
 0x143   : > { %v435_v7 = vmul.f32 0.6931472, %v728_v5 }
 0x144   : > { %v730_v8 = vpop.eup %729 }
 0x145   : > { %v439_v9 = vmul.f32 %v438_v6, %v435_v7  ;;  %v437_v10 = vmul.f32 0.6931472, %v730_v8 }
 0x147   : > { %v441_v11 = vmul.f32 1.442695, %v439_v9  ;;  %v440_v12 = vmul.f32 %v438_v6, %v437_v10 }
 0x149   : > { %731 = vpow2.f32 %v441_v11  ;;  %v443_v13 = vmul.f32 1.442695, %v440_v12 }
 0x14b   : > { %733 = vpow2.f32 %v443_v13 }
 0x156   : > { %v732_v15 = vpop.eup %731 }
 0x157   : > { %v451_v16 = vmul.f32 %v732_v15, %v449_v14 }
 0x158   : > { %v734_v17 = vpop.eup %733 }
 0x159   : > { %v452_v19 = vmul.f32 %v734_v17, %v449_v14  ;;  %v459_v20 = vadd.f32 %v457_v18, %v451_v16 }
 0x15b   : > { %v460_v21 = vadd.f32 %v457_v18, %v452_v19  ;;  %461 = vst [vmem:[%s299_s17] sm:$0xff] %v459_v20 }
 0x15d   : > { %462 = vst [vmem:[%s299_s17 + $0x8] sm:$0xff] %v460_v21 }
 0x15e   : > { %791 = shalt.err (!%p788_p9)
}
 0x15f   : > { %s792_s29 = scalar_lea.hbm %s478_s28, 256  ;;  %s796_s10 = scalar_lea.hbm %s1084_s5, 512 }
 0x160   : > { %p793_p13 = scmp.ne.s32.totalorder %s478_s28, %s792_s29  ;;  %p797_p11 = scmp.lt.s32.totalorder %s478_s28, %s1084_s5 }
 0x161   : > { %p798_p5 = scmp.lt.s32.totalorder %s796_s10, %s792_s29 }
 0x162   : > { %p794_p4 = pnand %p793_p13, %p1103_p7 }
 0x163   : > { %p799_p0 = por %p798_p5, %p797_p11 }
 0x164   : > { %p795_p6 = pneg %p794_p4 }
 0x166   : > { %p800_p3 = pnand %p799_p0, %p795_p6 }
 0x168   : > { %803 = shalt.err (!%p800_p3)
}
 0x169   : > { %624 = dma.vmem_to_hbm [thread:$0]  (%p1103_p7), %s481_s25, 256, %s478_s28, %s464_s7  }
 0x16a PF: > { %s1104_s12 = sld [smem:[#allocation13_spill]]  ;;  %s492_s14 = sand.u32 1, %s842_s18  }
 0x16b   : > { %s1105_s9 = sld [smem:[#allocation12_spill]]  ;;  %s493_s17 = scalar_lea.sflag [#allocation5], %s492_s14 }
 0x170   : > { %p1106_p12 = scmp.ne.s32.totalorder %s1104_s12, 0 }
 0x171   : > { %p1107_p2 = scmp.ge.s32.totalorder %s1105_s9, 2 }
 0x173   : > { %p635_p1 = pnand %p1107_p2, %p1106_p12 }
 0x175   : > { %p636_p10 = pneg %p635_p1 }
 0x177   : > { %837 = dma.done.wait (%p636_p10), %s493_s17, 256  }
 0x178   : > { %839 = vsyncadd (%p636_p10), %s493_s17, 4294967040  ;;  %s22_s24 = sadd.s32 1, %s1105_s9   ;;  %s1108_s18 = smov %s846_s19 }
 0x179   : > { %p19_p8 = scmp.ge.s32.totalorder %s22_s24, 4   ;;  %s1109_s19 = smov %s850_s20 }
 0x17a   : > { %s1110_s20 = smov %s1008_s23  ;;  %s1111_s21 = smov %s858_s22 }
 0x17b   : > { %s1112_s22 = smov %s1115_s13  ;;  %s1113_s23 = smov %s22_s24 }
 0x17c   :  { %21 = sbr.rel (!%p19_p8) target bundleno = 9 (0x9), region = 101 }
 0x181   :  { %498 = vsyncpa [#allocation4], 1 }
 0x182   :  { %500 = vsyncpa [#allocation4 + $0x1], 1 }
 0x183   :  { %501 = vsyncpa [#allocation5], 1 }
 0x184   :  { %503 = vsyncpa [#allocation5 + $0x1], 1 }
 0x185   :  { %504 = vsyncpa [#allocation6], 1 }
 0x186   :  { %506 = vsyncpa [#allocation6 + $0x1], 1 }

</bundles_post_ra>
